<compile_context>
chip_gen: v5e
topology: v5e:2x2
jax: 0.10.0
libtpu: 0.0.40
codegen_flags: <defaults>
</compile_context>

<pallas_src>
import jax
import jax.numpy as jnp
from jax.experimental import pallas as pl
from jax.experimental.pallas import tpu as pltpu

_LANES = 128
_TILE_CAP = 2048  # packed rows per grid step (multiple of 128)


def _affine_kernel(x_ref, w_ref, b_ref, o_ref):
    """Fused affine map on one packed batch tile, transposed / lane-dense output.

    x_ref: (tbp, P*F) f32   packed activations (P logical samples per physical row)
    w_ref: (P, P*F)  f32    block-diagonal, pre-transposed collapsed weight
    b_ref: (1, 1)    f32    collapsed bias (SMEM)
    o_ref: (P, tbp)  f32    o[p, m] == y[P*m + p]
    """
    # NOTE: if upstream can supply bf16 activations, cast w_kt to bf16 host-side and
    # this dot keeps an f32 MXU accumulate; do NOT add a separate cast pass on x.
    y_t = jnp.dot(w_ref[...], x_ref[...].T, preferred_element_type=jnp.float32)
    o_ref[...] = (y_t + b_ref[0, 0]).astype(o_ref.dtype)


def prepare_affine(params):
    """Fold the 4 linear layers into one affine map and pre-pack the weight.

    Done ONCE (outside the per-call path) -> the forward pass has no tiny XLA ops
    beyond the reshape/slice around the kernel.
    Returns (w_kt, b_eff): w_kt (P, P*F) block-diag transposed weight, b_eff (1,1).
    """
    w = params["w1"]
    b = params["b1"]
    for i in range(2, 5):
        w = w @ params[f"w{i}"]
        b = b @ params[f"w{i}"] + params[f"b{i}"]
    # w: (F, 1), b: (1, 1)
    F = w.shape[0]
    P = _LANES // F if (F <= _LANES and _LANES % F == 0) else 1
    if P > 1:
        # Row p of w_kt holds W_eff^T in columns [p*F, (p+1)*F)  -> (P, P*F).
        w_kt = jnp.kron(jnp.eye(P, dtype=w.dtype), w.T)
    else:
        w_kt = w.T
    return w_kt, b.reshape(1, 1)


def _pick_tile(bp_rows):
    if bp_rows <= _TILE_CAP:
        return bp_rows      # one full-array block (always layout-legal)
    return _TILE_CAP        # multiple of 128 -> legal for the lane-dense out block


def mymodel_forward(x, w_kt, b_eff, *, tile_rows=None):
    """x: (B, F) float32. w_kt: (P, P*F) collapsed weight. b_eff: (1, 1) bias."""
    B, F = x.shape
    P, PF = w_kt.shape
    assert PF == P * F, "collapsed weight does not match input feature count"

    # Pad only up to a multiple of P (<= P-1 rows, only when B % P != 0) so that the
    # packing reshape below is a pure row-major reinterpretation.  The common
    # aligned case is fully zero-copy; no padding to a grid multiple is ever done.
    rem = B % P
    if rem:
        x = jnp.pad(x, ((0, P - rem), (0, 0)))
    Bp = x.shape[0]
    bp_rows = Bp // P
    x_packed = x.reshape(bp_rows, PF)          # free reshape (row-major)

    tbp = tile_rows if tile_rows is not None else _pick_tile(bp_rows)
    assert tbp == bp_rows or tbp % 128 == 0, (
        "tile_rows must equal the packed batch or be a multiple of 128")
    grid_m = pl.cdiv(bp_rows, tbp)             # ragged last block handled by Pallas

    out_t = pl.pallas_call(
        _affine_kernel,
        out_shape=jax.ShapeDtypeStruct((P, bp_rows), jnp.float32),
        grid_spec=pltpu.PrefetchScalarGridSpec(
            num_scalar_prefetch=0,
            grid=(grid_m,),
            in_specs=[
                pl.BlockSpec((tbp, PF), lambda i: (i, 0)),          # packed x tile
                pl.BlockSpec((P, PF), lambda i: (0, 0)),            # resident weight
                pl.BlockSpec(memory_space=pltpu.MemorySpace.SMEM),  # scalar bias
            ],
            out_specs=pl.BlockSpec((P, tbp), lambda i: (0, i)),     # lane-dense
        ),
        # tbp <= 2048 -> ~2-3 MiB VMEM total; under every generation's scoped
        # default, so no vmem_limit_bytes override is required.
        compiler_params=pltpu.CompilerParams(
            dimension_semantics=("parallel",)),
    )(x_packed, w_kt, b_eff)

    # out_t[p, m] == y[P*m + p]  ->  transpose the (tiny) output, flatten, drop pad.
    return out_t.T.reshape(Bp, 1)[:B]


def init_params(key, in_features=32):
    """Deterministic init mirroring nn.Linear shapes (stored transposed: (in, out))."""
    dims = [(in_features, 8), (8, 4), (4, 2), (2, 1)]
    params = {}
    for idx, (fin, fout) in enumerate(dims, start=1):
        key, kw, kb = jax.random.split(key, 3)
        bound = 1.0 / jnp.sqrt(fin)          # PyTorch-style uniform bound
        params[f"w{idx}"] = jax.random.uniform(
            kw, (fin, fout), jnp.float32, -bound, bound)
        params[f"b{idx}"] = jax.random.uniform(
            kb, (1, fout), jnp.float32, -bound, bound)
    return params


def reference_forward(x, params):
    """Sequential 4-layer reference (matches the PyTorch module semantics)."""
    y = x
    for i in range(1, 5):
        y = y @ params[f"w{i}"] + params[f"b{i}"]
    return y


if __name__ == "__main__":
    key = jax.random.PRNGKey(0)
    kx, kp = jax.random.split(key)

    B, F = 8, 32
    x = jax.random.normal(kx, (B, F), jnp.float32)
    params = init_params(kp, in_features=F)

    # Collapse + block-diagonal replication done once, outside the per-call path.
    w_kt, b_eff = prepare_affine(params)

    out = mymodel_forward(x, w_kt, b_eff)
    out = jax.block_until_ready(out)

    ref = reference_forward(x, params)
    assert out.shape == (B, 1)
    # Collapse reorders f32 rounding vs the sequential reference -> not bit-exact.
    assert jnp.allclose(out, ref, atol=1e-5, rtol=1e-5), "mismatch vs reference"

    print("KERNEL_OK")
</pallas_src>

<mosaic_0001>
module attributes {stable_mosaic.version = 11 : i64} {
  func.func @_affine_kernel(%arg0: i32, %arg1: memref<2x128xf32, #tpu.memory_space<vmem>>, %arg2: memref<4x128xf32, #tpu.memory_space<vmem>>, %arg3: memref<1x1xf32, #tpu.memory_space<smem>>, %arg4: memref<4x2xf32, #tpu.memory_space<vmem>>) attributes {dimension_semantics = [#tpu.dimension_semantics<parallel>], iteration_bounds = array<i64: 1>, scalar_prefetch = 0 : i64, scratch_operands = 0 : i64, tpu.core_type = #tpu.core_type<tc>, window_params = [{transform_indices = @transform_0, window_bounds = array<i64: 2, 128>}, {pipeline_mode = #tpu.pipeline_mode<synchronous>, transform_indices = @transform_1, window_bounds = array<i64: 4, 128>}, {transform_indices = @transform_2, window_bounds = array<i64: 1, 1>}, {transform_indices = @transform_3, window_bounds = array<i64: 4, 2>}]} {
    %c0 = arith.constant 0 : index
    %c0_0 = arith.constant 0 : index
    %0 = vector.load %arg2[%c0, %c0_0] : memref<4x128xf32, #tpu.memory_space<vmem>>, vector<4x128xf32>
    %c0_1 = arith.constant 0 : index
    %c0_2 = arith.constant 0 : index
    %1 = vector.load %arg1[%c0_1, %c0_2] : memref<2x128xf32, #tpu.memory_space<vmem>>, vector<2x128xf32>
    %2 = tpu.transpose %1, [1, 0] : vector<2x128xf32> -> vector<128x2xf32>
    %cst = arith.constant dense<0.000000e+00> : vector<4x2xf32>
    %3 = tpu.matmul %0, %2, %cst {dimension_numbers = #tpu.dot_dimension_numbers<[1], [0], [0], [1], [0, 0, 1, 1], [], []>} : vector<4x128xf32>, vector<128x2xf32>, vector<4x2xf32> -> vector<4x2xf32>
    %c0_3 = arith.constant 0 : index
    %c0_4 = arith.constant 0 : index
    %4 = memref.load %arg3[%c0_3, %c0_4] : memref<1x1xf32, #tpu.memory_space<smem>>
    %5 = vector.broadcast %4 : f32 to vector<4x2xf32>
    %6 = arith.addf %3, %5 : vector<4x2xf32>
    %c0_5 = arith.constant 0 : index
    %c0_6 = arith.constant 0 : index
    %7 = vector.load %arg4[%c0_5, %c0_6] : memref<4x2xf32, #tpu.memory_space<vmem>>, vector<4x2xf32>
    tpu.vector_store %arg4[%c0_5, %c0_6], %6 {strides = array<i32>} : memref<4x2xf32, #tpu.memory_space<vmem>>, vector<4x2xf32>,
    return
  }
  func.func @transform_0(%arg0: i32) -> (i32, i32) {
    %c0_i32 = arith.constant 0 : i32
    %c0_i32_0 = arith.constant 0 : i32
    return %arg0, %c0_i32 : i32, i32
  }
  func.func @transform_1(%arg0: i32) -> (i32, i32) {
    %c0_i32 = arith.constant 0 : i32
    %c0_i32_0 = arith.constant 0 : i32
    %c0_i32_1 = arith.constant 0 : i32
    return %c0_i32, %c0_i32_0 : i32, i32
  }
  func.func @transform_2(%arg0: i32) -> (i32, i32) {
    %c0_i32 = arith.constant 0 : i32
    %c0_i32_0 = arith.constant 0 : i32
    %c0_i32_1 = arith.constant 0 : i32
    return %c0_i32, %c0_i32_0 : i32, i32
  }
  func.func @transform_3(%arg0: i32) -> (i32, i32) {
    %c0_i32 = arith.constant 0 : i32
    %c0_i32_0 = arith.constant 0 : i32
    return %c0_i32, %arg0 : i32, i32
  }
}

</mosaic_0001>

<bundles_post_ra>
// kernel: tpu_custom_call.1
= control target key start
LH: loop header
LB: loop body
LE: loop exit
PB: predicated region body
PF: predicated region fallthrough
CT: control target
= control target key end

     0   :  { %9 = vsyncpa [#allocation4], 0  ;;  %s87_s15 = smov [#allocation3]   ;;  %s120_s0 = inlined_call_operand.vmem [shape: f32[2,128], index: 0, kind: input, shape index: {}]   ;;  %s121_s1 = inlined_call_operand.hbm [shape: f32[4,128], index: 1, kind: input, shape index: {}]   ;;  %s122_s2 = inlined_call_operand.<no memory space> [shape: f32[1,1], index: 2, kind: input, shape index: {}]   ;;  %s123_s3 = inlined_call_operand.vmem [shape: f32[4,2], index: 3, kind: output, shape index: {}]  }
   0x1   :  { %s17_s14 = sshll.u32 %s121_s1, 4  ;;  %s19_s16 = sshll.u32 %s87_s15, 4  ;;  %s18_s14 = int_to_ptr.hbm [resolvable:$true] %s17_s14  ;;  %s20_s16 = int_to_ptr.vmem [resolvable:$true] %s19_s16 }
   0x2   :  { %22 = dma.hbm_to_vmem [thread:$0]  %s18_s14, 64, %s20_s16, [#allocation4]  }
   0x3   :  { %85 = dma.done.wait [#allocation4], 64  }
   0x4   :  { %86 = vsyncadd [#allocation4], 4294967232  ;;  %v30_v0 = vld [vmem:[%s120_s0] sm:$0x3]  ;;  %v32_v2 = vstv %s122_s2  ;;  %vm53_vm0 = vcmask 11264  }
   0x5   :  { %48 = vmatpush.xpose.msra.mxu0 %v30_v0  ;;  %v29_v1 = vld [vmem:[#allocation3] sm:$0xf] }
   0x8   :  { %49 = vmatmul.f32.vlgmr.msra.gmra.mxu0 %v29_v1 }
  0x85   :  { %v50_v3 = vpop.f32.mrf.mxu0 }
  0x86   :  { %v51_v4 = vadd.f32 %v50_v3, %v32_v2 }
  0x88   :  { %54 = vst.msk [vmem:[%s123_s3] sm:$0xf] %vm53_vm0, %v51_v4 }
  0x89   :  { %59 = vsyncpa [#allocation4], 1 }

</bundles_post_ra>
